<compile_context>
chip_gen: v7x
topology: tpu7x:2x2x1
jax: 0.10.0
libtpu: 0.0.40
codegen_flags: <defaults>
</compile_context>

<pallas_src>
import functools
import math

import jax
import jax.numpy as jnp
from jax import lax
from jax.experimental import pallas as pl
from jax.experimental.pallas import tpu as pltpu


def mha_kernel(x_ref, wqkv_ref, bqkv_ref, wo_ref, bo_ref, o_ref,
               q_scr, k_scr, v_scr, attn_scr, *, num_heads, head_dim, q_tile):
    H, D, TQ = num_heads, head_dim, q_tile
    S = x_ref.shape[0]
    HD = H * D
    qi = pl.program_id(1)

    # ---- Once per batch element: fused QKV projection -> per-head scratch ----
    @pl.when(qi == 0)
    def _project_qkv():
        x = x_ref[...].astype(jnp.bfloat16)                        # (S, E)
        qkv = jnp.dot(x, wqkv_ref[...],
                      preferred_element_type=jnp.float32)          # (S, 3*HD)
        qkv = qkv + bqkv_ref[...]
        scale = 1.0 / math.sqrt(D)
        q = qkv[:, :HD] * scale          # fold 1/sqrt(D) into Q once
        k = qkv[:, HD:2 * HD]
        v = qkv[:, 2 * HD:3 * HD]
        for h in range(H):               # static: just head-splitting stores
            q_scr[h] = q[:, h * D:(h + 1) * D].astype(jnp.bfloat16)
            k_scr[h] = k[:, h * D:(h + 1) * D].astype(jnp.bfloat16)
            v_scr[h] = v[:, h * D:(h + 1) * D].astype(jnp.bfloat16)

    # ---- Attention for this query tile, all heads batched on the MXU ----
    q_start = pl.multiple_of(qi * TQ, TQ)
    qh = q_scr[:, pl.ds(q_start, TQ), :]                           # (H, TQ, D)
    kh = k_scr[...]                                                # (H, S, D)
    vh = v_scr[...]                                                # (H, S, D)

    # scores[h, i, j] = qh[h, i, :] . kh[h, j, :]   (already scaled via Q)
    scores = lax.dot_general(qh, kh, (((2,), (2,)), ((0,), (0,))),
                             preferred_element_type=jnp.float32)   # (H, TQ, S)

    # Causal mask for this query tile (global row index = q_start + local row).
    row = lax.broadcasted_iota(jnp.int32, (TQ, S), 0) + q_start
    col = lax.broadcasted_iota(jnp.int32, (TQ, S), 1)
    scores = jnp.where((col <= row)[None, :, :], scores, -jnp.inf)

    # Numerically-stable softmax with deferred normalization.
    m = jnp.max(scores, axis=-1, keepdims=True)                    # (H, TQ, 1)
    e = jnp.exp(scores - m)                                        # (H, TQ, S)
    denom = jnp.sum(e, axis=-1, keepdims=True)                     # (H, TQ, 1)

    pv = lax.dot_general(e.astype(jnp.bfloat16), vh,
                         (((2,), (1,)), ((0,), (0,))),
                         preferred_element_type=jnp.float32)       # (H, TQ, D)
    out_heads = pv * pl.reciprocal(denom, approx=True)             # (H, TQ, D)

    # Concatenate heads via scratch (no jnp.concatenate of narrow slices).
    for h in range(H):
        attn_scr[:, h * D:(h + 1) * D] = out_heads[h].astype(jnp.bfloat16)

    # ---- Output projection ----
    out = jnp.dot(attn_scr[...], wo_ref[...],
                  preferred_element_type=jnp.float32) + bo_ref[...]
    o_ref[...] = out.astype(o_ref.dtype)


def _pick_q_tile(S):
    for t in (256, 128):
        if S % t == 0:
            return t
    return S


def multi_head_attention(x, wq, bq, wk, bk, wv, bv, wo, bo, *, num_heads, head_dim):
    B, S, E = x.shape
    H, D = num_heads, head_dim
    HD = H * D
    TQ = _pick_q_tile(S)
    NQ = S // TQ

    # Fuse the three projections; cast MXU operands to bf16 (f32 accumulation).
    w_qkv = jnp.concatenate([wq, wk, wv], axis=1).astype(jnp.bfloat16)  # (E, 3*HD)
    b_qkv = jnp.concatenate([bq, bk, bv], axis=1).astype(jnp.float32)   # (1, 3*HD)
    wo_b = wo.astype(jnp.bfloat16)
    bo_f = bo.astype(jnp.float32)

    kernel = functools.partial(mha_kernel, num_heads=H, head_dim=D, q_tile=TQ)

    return pl.pallas_call(
        kernel,
        out_shape=jax.ShapeDtypeStruct((B, S, E), x.dtype),
        grid=(B, NQ),
        in_specs=[
            pl.BlockSpec((None, S, E), lambda b, qi: (b, 0, 0)),     # x (full seq)
            pl.BlockSpec((E, 3 * HD), lambda b, qi: (0, 0)),         # fused W_qkv
            pl.BlockSpec((1, 3 * HD), lambda b, qi: (0, 0)),         # fused b_qkv
            pl.BlockSpec((HD, E), lambda b, qi: (0, 0)),             # W_o
            pl.BlockSpec((1, E), lambda b, qi: (0, 0)),              # b_o
        ],
        out_specs=pl.BlockSpec((None, TQ, E), lambda b, qi: (b, qi, 0)),
        scratch_shapes=[
            pltpu.VMEM((H, S, D), jnp.bfloat16),   # Q (pre-scaled), per head
            pltpu.VMEM((H, S, D), jnp.bfloat16),   # K per head
            pltpu.VMEM((H, S, D), jnp.bfloat16),   # V per head
            pltpu.VMEM((TQ, HD), jnp.bfloat16),    # concatenated head outputs
        ],
        compiler_params=pltpu.CompilerParams(
            dimension_semantics=("parallel", "arbitrary")),
    )(x, w_qkv, b_qkv, wo_b, bo_f)


def reference_mha(x, wq, bq, wk, bk, wv, bv, wo, bo, *, num_heads, head_dim):
    """Pure-JAX f32 reference mirroring the PyTorch forward exactly."""
    B, S, E = x.shape
    H, D = num_heads, head_dim
    q = (x @ wq + bq).reshape(B, S, H, D).transpose(0, 2, 1, 3)
    k = (x @ wk + bk).reshape(B, S, H, D).transpose(0, 2, 1, 3)
    v = (x @ wv + bv).reshape(B, S, H, D).transpose(0, 2, 1, 3)
    scores = jnp.einsum("bhqd,bhkd->bhqk", q, k) / math.sqrt(D)
    mask = jnp.tril(jnp.ones((S, S)))
    scores = jnp.where(mask == 0, -jnp.inf, scores)
    p = jax.nn.softmax(scores, axis=-1)
    o = jnp.einsum("bhqk,bhkd->bhqd", p, v)
    o = o.transpose(0, 2, 1, 3).reshape(B, S, H * D)
    return o @ wo + bo


if __name__ == "__main__":
    # Small, deterministic config consistent with the module's forward.
    batch, seq_len, embed_dim = 2, 8, 32
    num_heads, head_dim = 4, 8
    HD = num_heads * head_dim

    key = jax.random.PRNGKey(0)
    keys = jax.random.split(key, 9)

    x = jax.random.normal(keys[0], (batch, seq_len, embed_dim), dtype=jnp.float32)

    def init_linear(kw, kb, fan_in, fan_out):
        bound = 1.0 / math.sqrt(fan_in)
        w = jax.random.uniform(kw, (fan_in, fan_out), jnp.float32, -bound, bound)
        b = jax.random.uniform(kb, (1, fan_out), jnp.float32, -bound, bound)
        return w, b

    wq, bq = init_linear(keys[1], keys[2], embed_dim, HD)
    wk, bk = init_linear(keys[3], keys[4], embed_dim, HD)
    wv, bv = init_linear(keys[5], keys[6], embed_dim, HD)
    wo, bo = init_linear(keys[7], keys[8], HD, embed_dim)

    out = multi_head_attention(x, wq, bq, wk, bk, wv, bv, wo, bo,
                               num_heads=num_heads, head_dim=head_dim)
    out = jax.block_until_ready(out)

    ref = reference_mha(x, wq, bq, wk, bk, wv, bv, wo, bo,
                        num_heads=num_heads, head_dim=head_dim)
    assert out.shape == (batch, seq_len, embed_dim)
    # bf16 MXU inputs + approx reciprocal -> looser tolerance vs f32 reference.
    assert jnp.allclose(out, ref, atol=2e-2, rtol=2e-2), "mismatch vs JAX reference"

    print("KERNEL_OK")
</pallas_src>

<mosaic_0001>
module attributes {stable_mosaic.version = 11 : i64} {
  func.func @mha_kernel(%arg0: i32, %arg1: i32, %arg2: memref<1x8x32xf32, #tpu.memory_space<vmem>>, %arg3: memref<32x96xbf16, #tpu.memory_space<vmem>>, %arg4: memref<1x96xf32, #tpu.memory_space<vmem>>, %arg5: memref<32x32xbf16, #tpu.memory_space<vmem>>, %arg6: memref<1x32xf32, #tpu.memory_space<vmem>>, %arg7: memref<1x8x32xf32, #tpu.memory_space<vmem>>, %arg8: memref<4x8x8xbf16, #tpu.memory_space<vmem>>, %arg9: memref<4x8x8xbf16, #tpu.memory_space<vmem>>, %arg10: memref<4x8x8xbf16, #tpu.memory_space<vmem>>, %arg11: memref<8x32xbf16, #tpu.memory_space<vmem>>) attributes {dimension_semantics = [#tpu.dimension_semantics<parallel>, #tpu.dimension_semantics<arbitrary>], iteration_bounds = array<i64: 2, 1>, scalar_prefetch = 0 : i64, scratch_operands = 4 : i64, tpu.core_type = #tpu.core_type<tc>, window_params = [{transform_indices = @transform_0, window_bounds = array<i64: 1, 8, 32>}, {pipeline_mode = #tpu.pipeline_mode<synchronous>, transform_indices = @transform_1, window_bounds = array<i64: 32, 96>}, {pipeline_mode = #tpu.pipeline_mode<synchronous>, transform_indices = @transform_2, window_bounds = array<i64: 1, 96>}, {pipeline_mode = #tpu.pipeline_mode<synchronous>, transform_indices = @transform_3, window_bounds = array<i64: 32, 32>}, {pipeline_mode = #tpu.pipeline_mode<synchronous>, transform_indices = @transform_4, window_bounds = array<i64: 1, 32>}, {transform_indices = @transform_5, window_bounds = array<i64: 1, 8, 32>}]} {
    %c0_i32 = arith.constant 0 : i32
    %0 = arith.cmpi eq, %arg1, %c0_i32 : i32
    %1 = arith.extui %0 : i1 to i32
    %c0_i32_0 = arith.constant 0 : i32
    %2 = arith.cmpi ne, %1, %c0_i32_0 : i32
    scf.if %2 {
      %c0_27 = arith.constant 0 : index
      %c0_28 = arith.constant 0 : index
      %c0_29 = arith.constant 0 : index
      %57 = vector.load %arg2[%c0_27, %c0_28, %c0_29] : memref<1x8x32xf32, #tpu.memory_space<vmem>>, vector<1x8x32xf32>
      %58 = vector.shape_cast %57 : vector<1x8x32xf32> to vector<8x32xf32>
      %59 = arith.truncf %58 : vector<8x32xf32> to vector<8x32xbf16>
      %c0_30 = arith.constant 0 : index
      %c0_31 = arith.constant 0 : index
      %60 = vector.load %arg3[%c0_30, %c0_31] : memref<32x96xbf16, #tpu.memory_space<vmem>>, vector<32x96xbf16>
      %cst_32 = arith.constant dense<0.000000e+00> : vector<8x96xf32>
      %61 = tpu.matmul %59, %60, %cst_32 {dimension_numbers = #tpu.dot_dimension_numbers<[1], [0], [0], [1], [0, 0, 1, 1], [], []>} : vector<8x32xbf16>, vector<32x96xbf16>, vector<8x96xf32> -> vector<8x96xf32>
      %c0_33 = arith.constant 0 : index
      %c0_34 = arith.constant 0 : index
      %62 = vector.load %arg4[%c0_33, %c0_34] : memref<1x96xf32, #tpu.memory_space<vmem>>, vector<1x96xf32>
      %63 = vector.broadcast %62 : vector<1x96xf32> to vector<8x96xf32>
      %64 = arith.addf %61, %63 : vector<8x96xf32>
      %65 = vector.extract_strided_slice %64 {offsets = [0, 0], sizes = [8, 32], strides = [1, 1]} : vector<8x96xf32> to vector<8x32xf32>
      %cst_35 = arith.constant 0.353553385 : f32
      %66 = vector.broadcast %cst_35 : f32 to vector<8x32xf32>
      %67 = arith.mulf %65, %66 : vector<8x32xf32>
      %68 = vector.extract_strided_slice %64 {offsets = [0, 32], sizes = [8, 32], strides = [1, 1]} : vector<8x96xf32> to vector<8x32xf32>
      %69 = vector.extract_strided_slice %64 {offsets = [0, 64], sizes = [8, 32], strides = [1, 1]} : vector<8x96xf32> to vector<8x32xf32>
      %70 = vector.extract_strided_slice %67 {offsets = [0, 0], sizes = [8, 8], strides = [1, 1]} : vector<8x32xf32> to vector<8x8xf32>
      %71 = arith.truncf %70 : vector<8x8xf32> to vector<8x8xbf16>
      %c0_36 = arith.constant 0 : index
      %c0_37 = arith.constant 0 : index
      %c0_38 = arith.constant 0 : index
      %72 = vector.load %arg8[%c0_36, %c0_37, %c0_38] : memref<4x8x8xbf16, #tpu.memory_space<vmem>>, vector<1x8x8xbf16>
      %73 = vector.shape_cast %72 : vector<1x8x8xbf16> to vector<8x8xbf16>
      %74 = vector.shape_cast %71 : vector<8x8xbf16> to vector<1x8x8xbf16>
      tpu.vector_store %arg8[%c0_36, %c0_37, %c0_38], %74 {strides = array<i32>} : memref<4x8x8xbf16, #tpu.memory_space<vmem>>, vector<1x8x8xbf16>,
      %75 = vector.extract_strided_slice %68 {offsets = [0, 0], sizes = [8, 8], strides = [1, 1]} : vector<8x32xf32> to vector<8x8xf32>
      %76 = arith.truncf %75 : vector<8x8xf32> to vector<8x8xbf16>
      %c0_39 = arith.constant 0 : index
      %c0_40 = arith.constant 0 : index
      %c0_41 = arith.constant 0 : index
      %77 = vector.load %arg9[%c0_39, %c0_40, %c0_41] : memref<4x8x8xbf16, #tpu.memory_space<vmem>>, vector<1x8x8xbf16>
      %78 = vector.shape_cast %77 : vector<1x8x8xbf16> to vector<8x8xbf16>
      %79 = vector.shape_cast %76 : vector<8x8xbf16> to vector<1x8x8xbf16>
      tpu.vector_store %arg9[%c0_39, %c0_40, %c0_41], %79 {strides = array<i32>} : memref<4x8x8xbf16, #tpu.memory_space<vmem>>, vector<1x8x8xbf16>,
      %80 = vector.extract_strided_slice %69 {offsets = [0, 0], sizes = [8, 8], strides = [1, 1]} : vector<8x32xf32> to vector<8x8xf32>
      %81 = arith.truncf %80 : vector<8x8xf32> to vector<8x8xbf16>
      %c0_42 = arith.constant 0 : index
      %c0_43 = arith.constant 0 : index
      %c0_44 = arith.constant 0 : index
      %82 = vector.load %arg10[%c0_42, %c0_43, %c0_44] : memref<4x8x8xbf16, #tpu.memory_space<vmem>>, vector<1x8x8xbf16>
      %83 = vector.shape_cast %82 : vector<1x8x8xbf16> to vector<8x8xbf16>
      %84 = vector.shape_cast %81 : vector<8x8xbf16> to vector<1x8x8xbf16>
      tpu.vector_store %arg10[%c0_42, %c0_43, %c0_44], %84 {strides = array<i32>} : memref<4x8x8xbf16, #tpu.memory_space<vmem>>, vector<1x8x8xbf16>,
      %85 = vector.extract_strided_slice %67 {offsets = [0, 8], sizes = [8, 8], strides = [1, 1]} : vector<8x32xf32> to vector<8x8xf32>
      %86 = arith.truncf %85 : vector<8x8xf32> to vector<8x8xbf16>
      %c1 = arith.constant 1 : index
      %c0_45 = arith.constant 0 : index
      %c0_46 = arith.constant 0 : index
      %87 = vector.load %arg8[%c1, %c0_45, %c0_46] : memref<4x8x8xbf16, #tpu.memory_space<vmem>>, vector<1x8x8xbf16>
      %88 = vector.shape_cast %87 : vector<1x8x8xbf16> to vector<8x8xbf16>
      %89 = vector.shape_cast %86 : vector<8x8xbf16> to vector<1x8x8xbf16>
      tpu.vector_store %arg8[%c1, %c0_45, %c0_46], %89 {strides = array<i32>} : memref<4x8x8xbf16, #tpu.memory_space<vmem>>, vector<1x8x8xbf16>,
      %90 = vector.extract_strided_slice %68 {offsets = [0, 8], sizes = [8, 8], strides = [1, 1]} : vector<8x32xf32> to vector<8x8xf32>
      %91 = arith.truncf %90 : vector<8x8xf32> to vector<8x8xbf16>
      %c1_47 = arith.constant 1 : index
      %c0_48 = arith.constant 0 : index
      %c0_49 = arith.constant 0 : index
      %92 = vector.load %arg9[%c1_47, %c0_48, %c0_49] : memref<4x8x8xbf16, #tpu.memory_space<vmem>>, vector<1x8x8xbf16>
      %93 = vector.shape_cast %92 : vector<1x8x8xbf16> to vector<8x8xbf16>
      %94 = vector.shape_cast %91 : vector<8x8xbf16> to vector<1x8x8xbf16>
      tpu.vector_store %arg9[%c1_47, %c0_48, %c0_49], %94 {strides = array<i32>} : memref<4x8x8xbf16, #tpu.memory_space<vmem>>, vector<1x8x8xbf16>,
      %95 = vector.extract_strided_slice %69 {offsets = [0, 8], sizes = [8, 8], strides = [1, 1]} : vector<8x32xf32> to vector<8x8xf32>
      %96 = arith.truncf %95 : vector<8x8xf32> to vector<8x8xbf16>
      %c1_50 = arith.constant 1 : index
      %c0_51 = arith.constant 0 : index
      %c0_52 = arith.constant 0 : index
      %97 = vector.load %arg10[%c1_50, %c0_51, %c0_52] : memref<4x8x8xbf16, #tpu.memory_space<vmem>>, vector<1x8x8xbf16>
      %98 = vector.shape_cast %97 : vector<1x8x8xbf16> to vector<8x8xbf16>
      %99 = vector.shape_cast %96 : vector<8x8xbf16> to vector<1x8x8xbf16>
      tpu.vector_store %arg10[%c1_50, %c0_51, %c0_52], %99 {strides = array<i32>} : memref<4x8x8xbf16, #tpu.memory_space<vmem>>, vector<1x8x8xbf16>,
      %100 = vector.extract_strided_slice %67 {offsets = [0, 16], sizes = [8, 8], strides = [1, 1]} : vector<8x32xf32> to vector<8x8xf32>
      %101 = arith.truncf %100 : vector<8x8xf32> to vector<8x8xbf16>
      %c2 = arith.constant 2 : index
      %c0_53 = arith.constant 0 : index
      %c0_54 = arith.constant 0 : index
      %102 = vector.load %arg8[%c2, %c0_53, %c0_54] : memref<4x8x8xbf16, #tpu.memory_space<vmem>>, vector<1x8x8xbf16>
      %103 = vector.shape_cast %102 : vector<1x8x8xbf16> to vector<8x8xbf16>
      %104 = vector.shape_cast %101 : vector<8x8xbf16> to vector<1x8x8xbf16>
      tpu.vector_store %arg8[%c2, %c0_53, %c0_54], %104 {strides = array<i32>} : memref<4x8x8xbf16, #tpu.memory_space<vmem>>, vector<1x8x8xbf16>,
      %105 = vector.extract_strided_slice %68 {offsets = [0, 16], sizes = [8, 8], strides = [1, 1]} : vector<8x32xf32> to vector<8x8xf32>
      %106 = arith.truncf %105 : vector<8x8xf32> to vector<8x8xbf16>
      %c2_55 = arith.constant 2 : index
      %c0_56 = arith.constant 0 : index
      %c0_57 = arith.constant 0 : index
      %107 = vector.load %arg9[%c2_55, %c0_56, %c0_57] : memref<4x8x8xbf16, #tpu.memory_space<vmem>>, vector<1x8x8xbf16>
      %108 = vector.shape_cast %107 : vector<1x8x8xbf16> to vector<8x8xbf16>
      %109 = vector.shape_cast %106 : vector<8x8xbf16> to vector<1x8x8xbf16>
      tpu.vector_store %arg9[%c2_55, %c0_56, %c0_57], %109 {strides = array<i32>} : memref<4x8x8xbf16, #tpu.memory_space<vmem>>, vector<1x8x8xbf16>,
      %110 = vector.extract_strided_slice %69 {offsets = [0, 16], sizes = [8, 8], strides = [1, 1]} : vector<8x32xf32> to vector<8x8xf32>
      %111 = arith.truncf %110 : vector<8x8xf32> to vector<8x8xbf16>
      %c2_58 = arith.constant 2 : index
      %c0_59 = arith.constant 0 : index
      %c0_60 = arith.constant 0 : index
      %112 = vector.load %arg10[%c2_58, %c0_59, %c0_60] : memref<4x8x8xbf16, #tpu.memory_space<vmem>>, vector<1x8x8xbf16>
      %113 = vector.shape_cast %112 : vector<1x8x8xbf16> to vector<8x8xbf16>
      %114 = vector.shape_cast %111 : vector<8x8xbf16> to vector<1x8x8xbf16>
      tpu.vector_store %arg10[%c2_58, %c0_59, %c0_60], %114 {strides = array<i32>} : memref<4x8x8xbf16, #tpu.memory_space<vmem>>, vector<1x8x8xbf16>,
      %115 = vector.extract_strided_slice %67 {offsets = [0, 24], sizes = [8, 8], strides = [1, 1]} : vector<8x32xf32> to vector<8x8xf32>
      %116 = arith.truncf %115 : vector<8x8xf32> to vector<8x8xbf16>
      %c3 = arith.constant 3 : index
      %c0_61 = arith.constant 0 : index
      %c0_62 = arith.constant 0 : index
      %117 = vector.load %arg8[%c3, %c0_61, %c0_62] : memref<4x8x8xbf16, #tpu.memory_space<vmem>>, vector<1x8x8xbf16>
      %118 = vector.shape_cast %117 : vector<1x8x8xbf16> to vector<8x8xbf16>
      %119 = vector.shape_cast %116 : vector<8x8xbf16> to vector<1x8x8xbf16>
      tpu.vector_store %arg8[%c3, %c0_61, %c0_62], %119 {strides = array<i32>} : memref<4x8x8xbf16, #tpu.memory_space<vmem>>, vector<1x8x8xbf16>,
      %120 = vector.extract_strided_slice %68 {offsets = [0, 24], sizes = [8, 8], strides = [1, 1]} : vector<8x32xf32> to vector<8x8xf32>
      %121 = arith.truncf %120 : vector<8x8xf32> to vector<8x8xbf16>
      %c3_63 = arith.constant 3 : index
      %c0_64 = arith.constant 0 : index
      %c0_65 = arith.constant 0 : index
      %122 = vector.load %arg9[%c3_63, %c0_64, %c0_65] : memref<4x8x8xbf16, #tpu.memory_space<vmem>>, vector<1x8x8xbf16>
      %123 = vector.shape_cast %122 : vector<1x8x8xbf16> to vector<8x8xbf16>
      %124 = vector.shape_cast %121 : vector<8x8xbf16> to vector<1x8x8xbf16>
      tpu.vector_store %arg9[%c3_63, %c0_64, %c0_65], %124 {strides = array<i32>} : memref<4x8x8xbf16, #tpu.memory_space<vmem>>, vector<1x8x8xbf16>,
      %125 = vector.extract_strided_slice %69 {offsets = [0, 24], sizes = [8, 8], strides = [1, 1]} : vector<8x32xf32> to vector<8x8xf32>
      %126 = arith.truncf %125 : vector<8x8xf32> to vector<8x8xbf16>
      %c3_66 = arith.constant 3 : index
      %c0_67 = arith.constant 0 : index
      %c0_68 = arith.constant 0 : index
      %127 = vector.load %arg10[%c3_66, %c0_67, %c0_68] : memref<4x8x8xbf16, #tpu.memory_space<vmem>>, vector<1x8x8xbf16>
      %128 = vector.shape_cast %127 : vector<1x8x8xbf16> to vector<8x8xbf16>
      %129 = vector.shape_cast %126 : vector<8x8xbf16> to vector<1x8x8xbf16>
      tpu.vector_store %arg10[%c3_66, %c0_67, %c0_68], %129 {strides = array<i32>} : memref<4x8x8xbf16, #tpu.memory_space<vmem>>, vector<1x8x8xbf16>,
    } else {
    }
    %c8_i32 = arith.constant 8 : i32
    %3 = arith.muli %arg1, %c8_i32 : i32
    %4 = tpu.assume_multiple %3, 8 : i32
    %c0 = arith.constant 0 : index
    %5 = arith.index_cast %4 : i32 to index
    %c0_1 = arith.constant 0 : index
    %6 = vector.load %arg8[%c0, %5, %c0_1] : memref<4x8x8xbf16, #tpu.memory_space<vmem>>, vector<4x8x8xbf16>
    %c0_2 = arith.constant 0 : index
    %c0_3 = arith.constant 0 : index
    %c0_4 = arith.constant 0 : index
    %7 = vector.load %arg9[%c0_2, %c0_3, %c0_4] : memref<4x8x8xbf16, #tpu.memory_space<vmem>>, vector<4x8x8xbf16>
    %c0_5 = arith.constant 0 : index
    %c0_6 = arith.constant 0 : index
    %c0_7 = arith.constant 0 : index
    %8 = vector.load %arg10[%c0_5, %c0_6, %c0_7] : memref<4x8x8xbf16, #tpu.memory_space<vmem>>, vector<4x8x8xbf16>
    %cst = arith.constant dense<0.000000e+00> : vector<4x8x8xf32>
    %9 = tpu.matmul %6, %7, %cst {dimension_numbers = #tpu.dot_dimension_numbers<[2], [2], [1], [1], [0, 0, 0, 1, 1, 1], [0], [0]>} : vector<4x8x8xbf16>, vector<4x8x8xbf16>, vector<4x8x8xf32> -> vector<4x8x8xf32>
    %10 = tpu.iota {dimensions = array<i32: 0>} : vector<8x8xi32>
    %11 = vector.broadcast %4 : i32 to vector<8x8xi32>
    %12 = arith.addi %10, %11 : vector<8x8xi32>
    %13 = tpu.iota {dimensions = array<i32: 1>} : vector<8x8xi32>
    %14 = arith.cmpi sle, %13, %12 : vector<8x8xi32>
    %15 = vector.shape_cast %14 : vector<8x8xi1> to vector<1x8x8xi1>
    %cst_8 = arith.constant 0xFF800000 : f32
    %16 = vector.shape_cast %15 : vector<1x8x8xi1> to vector<1x8x8xi1>
    %17 = vector.broadcast %16 : vector<1x8x8xi1> to vector<4x8x8xi1>
    %18 = vector.broadcast %cst_8 : f32 to vector<4x8x8xf32>
    %19 = arith.select %17, %9, %18 : vector<4x8x8xi1>, vector<4x8x8xf32>
    %cst_9 = arith.constant dense<0xFF800000> : vector<4x8xf32>
    %20 = vector.multi_reduction <maximumf>, %19, %cst_9 [2] : vector<4x8x8xf32> to vector<4x8xf32>
    %21 = vector.shape_cast %20 : vector<4x8xf32> to vector<4x8x1xf32>
    %22 = vector.broadcast %21 : vector<4x8x1xf32> to vector<4x8x8xf32>
    %23 = arith.subf %19, %22 : vector<4x8x8xf32>
    %24 = math.exp %23 : vector<4x8x8xf32>
    %cst_10 = arith.constant dense<0.000000e+00> : vector<4x8xf32>
    %25 = vector.multi_reduction <add>, %24, %cst_10 [2] : vector<4x8x8xf32> to vector<4x8xf32>
    %26 = vector.shape_cast %25 : vector<4x8xf32> to vector<4x8x1xf32>
    %27 = arith.truncf %24 : vector<4x8x8xf32> to vector<4x8x8xbf16>
    %cst_11 = arith.constant dense<0.000000e+00> : vector<4x8x8xf32>
    %28 = tpu.matmul %27, %8, %cst_11 {dimension_numbers = #tpu.dot_dimension_numbers<[2], [1], [1], [2], [0, 0, 0, 1, 1, 2], [0], [0]>} : vector<4x8x8xbf16>, vector<4x8x8xbf16>, vector<4x8x8xf32> -> vector<4x8x8xf32>
    %29 = tpu.reciprocal %26 {approx = true} : vector<4x8x1xf32> -> vector<4x8x1xf32>
    %30 = vector.broadcast %29 : vector<4x8x1xf32> to vector<4x8x8xf32>
    %31 = arith.mulf %28, %30 : vector<4x8x8xf32>
    %32 = vector.extract_strided_slice %31 {offsets = [0, 0, 0], sizes = [1, 8, 8], strides = [1, 1, 1]} : vector<4x8x8xf32> to vector<1x8x8xf32>
    %33 = vector.shape_cast %32 : vector<1x8x8xf32> to vector<8x8xf32>
    %34 = arith.truncf %33 : vector<8x8xf32> to vector<8x8xbf16>
    %c0_12 = arith.constant 0 : index
    %c0_13 = arith.constant 0 : index
    %35 = vector.load %arg11[%c0_12, %c0_13] : memref<8x32xbf16, #tpu.memory_space<vmem>>, vector<8x8xbf16>
    tpu.vector_store %arg11[%c0_12, %c0_13], %34 {strides = array<i32>} : memref<8x32xbf16, #tpu.memory_space<vmem>>, vector<8x8xbf16>,
    %36 = vector.extract_strided_slice %31 {offsets = [1, 0, 0], sizes = [1, 8, 8], strides = [1, 1, 1]} : vector<4x8x8xf32> to vector<1x8x8xf32>
    %37 = vector.shape_cast %36 : vector<1x8x8xf32> to vector<8x8xf32>
    %38 = arith.truncf %37 : vector<8x8xf32> to vector<8x8xbf16>
    %c0_14 = arith.constant 0 : index
    %c8 = arith.constant 8 : index
    %39 = vector.load %arg11[%c0_14, %c8] : memref<8x32xbf16, #tpu.memory_space<vmem>>, vector<8x8xbf16>
    tpu.vector_store %arg11[%c0_14, %c8], %38 {strides = array<i32>} : memref<8x32xbf16, #tpu.memory_space<vmem>>, vector<8x8xbf16>,
    %40 = vector.extract_strided_slice %31 {offsets = [2, 0, 0], sizes = [1, 8, 8], strides = [1, 1, 1]} : vector<4x8x8xf32> to vector<1x8x8xf32>
    %41 = vector.shape_cast %40 : vector<1x8x8xf32> to vector<8x8xf32>
    %42 = arith.truncf %41 : vector<8x8xf32> to vector<8x8xbf16>
    %c0_15 = arith.constant 0 : index
    %c16 = arith.constant 16 : index
    %43 = vector.load %arg11[%c0_15, %c16] : memref<8x32xbf16, #tpu.memory_space<vmem>>, vector<8x8xbf16>
    tpu.vector_store %arg11[%c0_15, %c16], %42 {strides = array<i32>} : memref<8x32xbf16, #tpu.memory_space<vmem>>, vector<8x8xbf16>,
    %44 = vector.extract_strided_slice %31 {offsets = [3, 0, 0], sizes = [1, 8, 8], strides = [1, 1, 1]} : vector<4x8x8xf32> to vector<1x8x8xf32>
    %45 = vector.shape_cast %44 : vector<1x8x8xf32> to vector<8x8xf32>
    %46 = arith.truncf %45 : vector<8x8xf32> to vector<8x8xbf16>
    %c0_16 = arith.constant 0 : index
    %c24 = arith.constant 24 : index
    %47 = vector.load %arg11[%c0_16, %c24] : memref<8x32xbf16, #tpu.memory_space<vmem>>, vector<8x8xbf16>
    tpu.vector_store %arg11[%c0_16, %c24], %46 {strides = array<i32>} : memref<8x32xbf16, #tpu.memory_space<vmem>>, vector<8x8xbf16>,
    %c0_17 = arith.constant 0 : index
    %c0_18 = arith.constant 0 : index
    %48 = vector.load %arg11[%c0_17, %c0_18] : memref<8x32xbf16, #tpu.memory_space<vmem>>, vector<8x32xbf16>
    %c0_19 = arith.constant 0 : index
    %c0_20 = arith.constant 0 : index
    %49 = vector.load %arg5[%c0_19, %c0_20] : memref<32x32xbf16, #tpu.memory_space<vmem>>, vector<32x32xbf16>
    %cst_21 = arith.constant dense<0.000000e+00> : vector<8x32xf32>
    %50 = tpu.matmul %48, %49, %cst_21 {dimension_numbers = #tpu.dot_dimension_numbers<[1], [0], [0], [1], [0, 0, 1, 1], [], []>} : vector<8x32xbf16>, vector<32x32xbf16>, vector<8x32xf32> -> vector<8x32xf32>
    %c0_22 = arith.constant 0 : index
    %c0_23 = arith.constant 0 : index
    %51 = vector.load %arg6[%c0_22, %c0_23] : memref<1x32xf32, #tpu.memory_space<vmem>>, vector<1x32xf32>
    %52 = vector.broadcast %51 : vector<1x32xf32> to vector<8x32xf32>
    %53 = arith.addf %50, %52 : vector<8x32xf32>
    %c0_24 = arith.constant 0 : index
    %c0_25 = arith.constant 0 : index
    %c0_26 = arith.constant 0 : index
    %54 = vector.load %arg7[%c0_24, %c0_25, %c0_26] : memref<1x8x32xf32, #tpu.memory_space<vmem>>, vector<1x8x32xf32>
    %55 = vector.shape_cast %54 : vector<1x8x32xf32> to vector<8x32xf32>
    %56 = vector.shape_cast %53 : vector<8x32xf32> to vector<1x8x32xf32>
    tpu.vector_store %arg7[%c0_24, %c0_25, %c0_26], %56 {strides = array<i32>} : memref<1x8x32xf32, #tpu.memory_space<vmem>>, vector<1x8x32xf32>,
    return
  }
  func.func @transform_0(%arg0: i32, %arg1: i32) -> (i32, i32, i32) {
    %c0_i32 = arith.constant 0 : i32
    %c0_i32_0 = arith.constant 0 : i32
    %c0_i32_1 = arith.constant 0 : i32
    return %arg0, %c0_i32, %c0_i32_0 : i32, i32, i32
  }
  func.func @transform_1(%arg0: i32, %arg1: i32) -> (i32, i32) {
    %c0_i32 = arith.constant 0 : i32
    %c0_i32_0 = arith.constant 0 : i32
    %c0_i32_1 = arith.constant 0 : i32
    return %c0_i32, %c0_i32_0 : i32, i32
  }
  func.func @transform_2(%arg0: i32, %arg1: i32) -> (i32, i32) {
    %c0_i32 = arith.constant 0 : i32
    %c0_i32_0 = arith.constant 0 : i32
    %c0_i32_1 = arith.constant 0 : i32
    return %c0_i32, %c0_i32_0 : i32, i32
  }
  func.func @transform_3(%arg0: i32, %arg1: i32) -> (i32, i32) {
    %c0_i32 = arith.constant 0 : i32
    %c0_i32_0 = arith.constant 0 : i32
    %c0_i32_1 = arith.constant 0 : i32
    return %c0_i32, %c0_i32_0 : i32, i32
  }
  func.func @transform_4(%arg0: i32, %arg1: i32) -> (i32, i32) {
    %c0_i32 = arith.constant 0 : i32
    %c0_i32_0 = arith.constant 0 : i32
    %c0_i32_1 = arith.constant 0 : i32
    return %c0_i32, %c0_i32_0 : i32, i32
  }
  func.func @transform_5(%arg0: i32, %arg1: i32) -> (i32, i32, i32) {
    %c0_i32 = arith.constant 0 : i32
    %c0_i32_0 = arith.constant 0 : i32
    return %arg0, %arg1, %c0_i32 : i32, i32, i32
  }
}

</mosaic_0001>

<bundles_post_ra>
// kernel: tpu_custom_call.1
= control target key start
LH: loop header
LB: loop body
LE: loop exit
PB: predicated region body
PF: predicated region fallthrough
CT: control target
= control target key end

     0   :  { %10 = vsyncpa [#allocation7], 0  ;;  %s1905_s0 = inlined_call_operand.hbm [shape: f32[2,8,32], index: 0, kind: input, shape index: {}]   ;;  %s1906_s1 = inlined_call_operand.hbm [shape: bf16[32,96], index: 1, kind: input, shape index: {}]   ;;  %s1907_s2 = inlined_call_operand.vmem [shape: f32[1,96], index: 2, kind: input, shape index: {}]   ;;  %s1908_s3 = inlined_call_operand.hbm [shape: bf16[32,32], index: 3, kind: input, shape index: {}]   ;;  %s1909_s4 = inlined_call_operand.vmem [shape: f32[1,32], index: 4, kind: input, shape index: {}]   ;;  %s1910_s5 = inlined_call_operand.hbm [shape: f32[2,8,32], index: 5, kind: output, shape index: {}]  }
   0x1   :  { %12 = vsyncpa [#allocation7 + $0x1], 0 }
   0x2   :  { %13 = vsyncpa [#allocation10], 0 }
   0x3   :  { %14 = vsyncpa [#allocation8], 0 }
   0x4   :  { %16 = vsyncpa [#allocation8 + $0x1], 0  ;;  %s1559_s18 = smov 0   ;;  %s1561_s19 = smov 0  }
   0x5   :  { %s1563_s20 = smov 0   ;;  %s1565_s21 = smov 0  }
   0x6   :  { %s1567_s22 = smov 0   ;;  %s1569_s23 = smov 0  }
   0x7 LB: > { %s1083_s24 = sadd.s32 4294967295, %s1505_s23   ;;  %s1084_s25 = sadd.s32 4294967294, %s1505_s23   ;;  %s1505_s23 = sphi %s1569_s23, %s22_s23   ;;  %s1501_s22 = sphi %s1567_s22, %s1932_s22   ;;  %s1497_s21 = sphi %s1565_s21, %s1931_s21   ;;  %s1493_s20 = sphi %s1563_s20, %s1930_s20   ;;  %s1489_s19 = sphi %s1561_s19, %s1929_s19   ;;  %s1485_s18 = sphi %s1559_s18, %s1928_s18  }
   0x8   : > { %p54_p0 = scmp.ne.s32.totalorder %s1489_s19, %s1485_s18  ;;  %p1593_p1 = scmp.eq.s32.totalorder %s1083_s24, 0 }
   0x9   : > { %p1597_p2 = scmp.eq.s32.totalorder %s1083_s24, 1  ;;  %p170_p3 = scmp.eq.s32.totalorder %s1084_s25, 1 }
   0xa   : > { %s1915_s26 = scalar_select %p1593_p1, 1, 0 }
   0xb   : > { %p1603_p4 = por %p1593_p1, %p54_p0  ;;  %p1085_p5 = scmp.ge.s32.totalorder %s1505_s23, 1 }
   0xc   : > { %p1608_p6 = por %p170_p3, %p54_p0  ;;  %p177_p7 = scmp.lt.s32.totalorder %s1505_s23, 3 }
   0xd   : > { %s1917_s28 = scalar_select %p1603_p4, 1, 0 }
   0xe   : > { %s1918_s29 = scalar_select %p1608_p6, 1, 0 }
   0xf   : > { %p1613_p8 = pnand %p1085_p5, %p177_p7  ;;  %s1507_s6 = smov [#allocation9]  }
  0x10   : > { %s189_s7 = sshll.u32 %s1507_s6, 4  ;;  %s1508_s9 = smov [#allocation11]   ;;  %s1617_s7 = int_to_ptr.vmem [resolvable:$true] %s189_s7 }
  0x11   : > { %p1224_p9 = pneg %p1613_p8  ;;  %s205_s10 = sshll.u32 %s1508_s9, 4  ;;  %s1628_s10 = int_to_ptr.vmem [resolvable:$true] %s205_s10 }
  0x12   : > { %s1333_s13 = scalar_lea.hbm %s1906_s1, 256 }
  0x13   : > { %p1624_p11 = pnand %p1224_p9, %p1593_p1  ;;  %p1334_p12 = scmp.ne.s32.totalorder %s1906_s1, %s1333_s13 }
  0x14   : > { %p1340_p5 = scmp.lt.u32.totalorder %s1333_s13, %s1906_s1 }
  0x15   : > { %p1335_p13 = pneg %p1624_p11 }
  0x17   : > { %p1336_p0 = pnand %p1335_p13, %p1334_p12 }
  0x19   : > { %p1337_p3 = pneg %p1336_p0 }
  0x1b   : > { %p1342_p7 = pnand %p1340_p5, %p1337_p3 }
  0x1d   : > { %1345 = shalt.err (!%p1342_p7)
}
  0x1e   : > { %s1346_s24 = scalar_lea.vmem %s1617_s7, 256  ;;  %p1354_p1 = scmp.lt.s32.totalorder %s1617_s7, %s1617_s7 }
  0x1f   : > { %p1347_p9 = scmp.ne.s32.totalorder %s1617_s7, %s1346_s24  ;;  %p1355_p12 = scmp.lt.s32.totalorder %s1346_s24, %s1346_s24 }
  0x21   : > { %p1349_p10 = pnand %p1347_p9, %p1335_p13  ;;  %p1356_p0 = por %p1355_p12, %p1354_p1 }
  0x23   : > { %p1350_p6 = pneg %p1349_p10 }
  0x25   : > { %p1357_p4 = pnand %p1356_p0, %p1350_p6 }
  0x27   : > { %1360 = shalt.err (!%p1357_p4)
}
  0x28   : > { %s1509_s25 = smov 64   ;;  %s1510_s6 = smov 4  }
  0x29   : > { %1227 = dma.hbm_to_vmem [thread:$0]  (!%p1624_p11), %s1906_s1, 256, %s1617_s7, [#allocation10], %s1509_s25, %s1509_s25, %s1510_s6  }
  0x2a   : > { %s1361_s14 = scalar_lea.hbm %s1908_s3, 256 }
  0x2b   : > { %p1362_p1 = scmp.ne.s32.totalorder %s1908_s3, %s1361_s14  ;;  %p1368_p10 = scmp.lt.u32.totalorder %s1361_s14, %s1908_s3 }
  0x2d   : > { %p1364_p4 = pnand %p1362_p1, %p1335_p13 }
  0x2f   : > { %p1365_p6 = pneg %p1364_p4 }
  0x31   : > { %p1370_p3 = pnand %p1368_p10, %p1365_p6 }
  0x33   : > { %1373 = shalt.err (!%p1370_p3)
}
  0x34   : > { %s1374_s7 = scalar_lea.vmem %s1628_s10, 256  ;;  %p1382_p12 = scmp.lt.s32.totalorder %s1628_s10, %s1628_s10 }
  0x35   : > { %p1375_p5 = scmp.ne.s32.totalorder %s1628_s10, %s1374_s7  ;;  %p1383_p0 = scmp.lt.s32.totalorder %s1374_s7, %s1374_s7 }
  0x37   : > { %p1377_p7 = pnand %p1375_p5, %p1335_p13  ;;  %p1384_p1 = por %p1383_p0, %p1382_p12 }
  0x39   : > { %p1378_p9 = pneg %p1377_p7 }
  0x3b   : > { %p1385_p4 = pnand %p1384_p1, %p1378_p9 }
  0x3d   : > { %1388 = shalt.err (!%p1385_p4)
}
  0x3e   : > { %1230 = dma.hbm_to_vmem [thread:$0]  (!%p1624_p11), %s1908_s3, 256, %s1628_s10, [#allocation10], %s1509_s25, %s1509_s25, %s1510_s6  }
  0x3f   : > { %s34_s12 = sadd.s32 1, %s1501_s22  ;;  %s41_s13 = sadd.s32 1, %s1493_s20 }
  0x40   : > { %p36_p13 = scmp.ge.s32.totalorder %s34_s12, 2  ;;  %p48_p6 = scmp.ne.s32.totalorder %s1493_s20, %s1489_s19 }
  0x41   : > { %p49_p10 = scmp.eq.s32.totalorder %s1505_s23, 0  ;;  %p1241_p3 = scmp.lt.s32.totalorder %s1505_s23, 2 }
  0x42   : > { %s1934_s12 = smov (%p36_p13, %s34_s12), 0  ;;  %p1692_p7 = por %p1597_p2, %p48_p6 }
  0x43   : > { %p50_p5 = por %p49_p10, %p48_p6  ;;  %s38_s14 = ssub.s32 %s1501_s22, %s1934_s12 }
  0x44   : > { %s1921_s8 = scalar_select %p1692_p7, 1, 0 }
  0x45   : > { %s222_s15 = sand.u32 1, %s1493_s20   ;;  %p39_p9 = scmp.eq.s32.totalorder %s38_s14, 0 }
  0x46   : > { %s1089_s10 = sshll.u32 %s222_s15, 3  ;;  %s1090_s25 = sshll.u32 %s1501_s22, 7 }
  0x47   : > { %s1701_s6 = scalar_select %p39_p9, %s1493_s20, %s41_s13  }
  0x48   : > { %s1706_s24 = scalar_lea.hbm %s1905_s0, %s1090_s25  ;;  %s226_s27 = scalar_lea.vmem [#allocation6], %s1089_s10 }
  0x49   : > { %s233_s7 = sshll.u32 %s226_s27, 4  ;;  %p1710_p2 = pnand %p1241_p3, %p50_p5  ;;  %s1714_s7 = int_to_ptr.vmem [resolvable:$true] %s233_s7 }
  0x4a   : > { %s223_s11 = scalar_lea.sflag [#allocation7], %s222_s15  ;;  %s1389_s13 = scalar_lea.hbm %s1706_s24, 128 }
  0x4b   : > { %p1390_p11 = scmp.ne.s32.totalorder %s1706_s24, %s1389_s13  ;;  %p1391_p12 = pneg %p1710_p2 }
  0x4c   : > { %s1394_s25 = scalar_lea.hbm %s1905_s0, 256  ;;  %p1395_p4 = scmp.lt.u32.totalorder %s1706_s24, %s1905_s0 }
  0x4d   : > { %p1392_p0 = pnand %p1391_p12, %p1390_p11  ;;  %p1396_p13 = scmp.lt.u32.totalorder %s1394_s25, %s1389_s13 }
  0x4e   : > { %p1398_p10 = scmp.lt.u32.totalorder %s1389_s13, %s1706_s24 }
  0x4f   : > { %p1393_p1 = pneg %p1392_p0  ;;  %p1397_p6 = por %p1396_p13, %p1395_p4 }
  0x51   : > { %p1399_p3 = por %p1398_p10, %p1397_p6 }
  0x53   : > { %p1400_p5 = pnand %p1399_p3, %p1393_p1 }
  0x55   : > { %1403 = shalt.err (!%p1400_p5)
}
  0x56   : > { %s1404_s15 = scalar_lea.vmem %s1714_s7, 128  ;;  %s1511_s27 = smov [#allocation6]  }
  0x57   : > { %p1405_p9 = scmp.ne.s32.totalorder %s1714_s7, %s1404_s15  ;;  %s1409_s14 = sshll.u32 %s1511_s27, 4  ;;  %s1410_s14 = int_to_ptr.vmem [resolvable:$false] %s1409_s14 }
  0x58   : > { %s1411_s10 = scalar_lea.vmem %s1410_s14, 256  ;;  %p1412_p7 = scmp.lt.s32.totalorder %s1714_s7, %s1410_s14 }
  0x59   : > { %p1407_p11 = pnand %p1405_p9, %p1391_p12  ;;  %p1413_p4 = scmp.lt.s32.totalorder %s1411_s10, %s1404_s15 }
  0x5b   : > { %p1408_p0 = pneg %p1407_p11  ;;  %p1414_p13 = por %p1413_p4, %p1412_p7 }
  0x5d   : > { %p1415_p6 = pnand %p1414_p13, %p1408_p0 }
  0x5f   : > { %1418 = shalt.err (!%p1415_p6)
}
  0x60   : > { %1234 = dma.hbm_to_vmem [thread:$0]  (!%p1710_p2), %s1706_s24, 128, %s1714_s7, %s223_s11  }
  0x61   : > { %242 = sbr.rel (%p1613_p8) target bundleno = 1420 (0x58c), region = 40  ;;  %s1744_s13 = sand.u32 (!%p1613_p8), 1, %s1489_s19  }
  0x62   : > { %s1092_s25 = sshll.u32 (!%p1613_p8), %s1744_s13, 3  ;;  %s245_s16 = scalar_lea.sflag (!%p1613_p8), [#allocation7], %s1744_s13 }
  0x63   : > { %s248_s17 = scalar_lea.vmem (!%p1613_p8), [#allocation6], %s1092_s25  ;;  %p1923_p7 = scmp.ne.s32.totalorder (!%p1613_p8), %s1917_s28, 0 }
  0x68   : > { %1472 = dma.done.wait (%p1923_p7), %s245_s16, 128  }
  0x69   : > { %1474 = vsyncadd (%p1923_p7), %s245_s16, 4294967168  ;;  %p1924_p2 = scmp.ne.s32.totalorder %s1915_s26, 0 }
  0x6b   : > { %1476 = dma.done.wait (%p1924_p2), [#allocation10], 512  }
  0x6c   : > { %1478 = vsyncadd (%p1924_p2), [#allocation10], 4294966784  ;;  %v1512_v0 = vmov 0.0   ;;  %vm1513_vm0 = vmmov 0   ;;  %v1313_v1 = vld [vmem:[#allocation9] sm:$0xff]   ;;  %v1314_v2 = vld [vmem:[#allocation9 + $0x8] sm:$0xff]   ;;  %v623_v39 = vlaneseq }
  0x6d   : > { %1148 = vmatprep.subr.bf16.mxu0 %v1512_v0  ;;  %1152 = vmatprep.mubr.msk.bf16.mxu0 %vm1513_vm0, %v1512_v0  ;;  %v288_v3 = vld [vmem:[%s248_s17] sm:$0xff]  ;;  %vm313_vm1 = vcmask 261120   ;;  %vm359_vm2 = vcmask 60416   ;;  %s1514_s30 = smov 80   ;;  %s1515_s24 = smov 96   ;;  %vm438_vm3 = vcmask 64512  }
  0x6e   : > { %1156 = vmatprep.subr.bf16.mxu1 %v1512_v0  ;;  %1158 = vmatprep.mubr.msk.bf16.mxu1 %vm1513_vm0, %v1512_v0  ;;  %v289_v4 = vpack.c.bf16 %v288_v3, %v288_v3  ;;  %v1096_v5 = vld [vmem:[%s1907_s2] ss:$0 sm:$0xff]  ;;  %s1516_s7 = smov 88   ;;  %s1517_s9 = smov 120   ;;  %vm679_vm4 = vcmask 1043456   ;;  %v624_v40 = vshrl.u32 %v623_v39, 7 }
  0x6f   : > { %1149 = vmatpush3.bf16.msra.mxu0 %v1313_v1  ;;  %s1518_s11 = smov 72   ;;  %s1519_s15 = smov 112   ;;  %v628_v41 = vand.u32 127, %v623_v39  ;;  %vm879_vm6 = vcmask 126016   ;;  %vm888_vm7 = vcmask 191616   ;;  %vm897_vm8 = vcmask 257216  }
  0x70   : > { %1150 = vmatprep.subr.bf16.mxu0 %v1512_v0  ;;  %s1520_s27 = smov 104   ;;  %s1521_s14 = smov 56  }
  0x71   : > { %s1522_s10 = smov 64   ;;  %vm629_vm5 = vcmp.le.s32.totalorder %v628_v41, %v624_v40  ;;  %s1523_s16 = smov 48  }
  0x72   : > { %s1524_s17 = smov 40   ;;  %s1525_s26 = smov 8  }
  0x73   : > { %1151 = vmatpush3.bf16.msra.mxu0 %v1314_v2  ;;  %s1526_s28 = smov 16   ;;  %p1925_p12 = scmp.ne.s32.totalorder %s1921_s8, 0 }
  0x74   : > { %1162 = vmatprep.subr.bf16.mxu0 %v1512_v0 }
  0x76   : > { %1153 = vmatmul.mubr.msk.bf16.vlgmr.msra.gmra.mrb[0].mxu0 %vm313_vm1, %v289_v4 }
  0x77   : > { %1164 = vmatprep.mubr.msk.bf16.mxu0 %vm1513_vm0, %v1512_v0 }
 0x149   : > { %v351_v6 = vpop.f32.mrb[0].mxu0 }
 0x14a   : > { %v352_v7 = vadd.f32 %v1096_v5, %v351_v6  ;;  %v1154_v8 = vpop.f32.mrb[1].mxu0 }
 0x14b   : > { %v354_v9 = vpop.f32.mrb[2].mxu0 }
 0x14c   : > { %v357_v10 = vmul.f32 0.35355338, %v352_v7  ;;  %v1772_v11 = vpack.c.bf16 %v352_v7, %v352_v7  ;;  %v1155_v12 = vpop.f32.mrb[3].mxu0 }
 0x14e   : > { %v358_v13 = vpack.c.bf16 %v357_v10, %v357_v10  ;;  %396 = vrot.lane.b32.xlu1 %v1772_v11, %s1514_s30  ;;  %365 = vrot.lane.b32.xlu0 %v1772_v11, %s1515_s24  ;;  %s1527_s30 = smov 24  }
 0x150   : > { %360 = vst.msk [vmem:[#allocation2] sm:$0xf] %vm359_vm2, %v358_v13 }
 0x152   : > { %381 = vrot.lane.b32.xlu0 %v1772_v11, %s1516_s7  ;;  %376 = vrot.lane.b32.xlu1 %v358_v13, %s1517_s9  ;;  %s1118_s9 = sshll.u32 %s1497_s21, 7  ;;  %s969_s21 = scalar_lea.sflag [#allocation8], %s1744_s13 }
 0x156   : > { %411 = vrot.lane.b32.xlu0 %v1772_v11, %s1518_s11  ;;  %391 = vrot.lane.b32.xlu1 %v358_v13, %s1519_s15  ;;  %s282_s11 = scalar_lea.vmem [#allocation12], %s1092_s25 }
 0x157   : > { %v426_v28 = vld [vmem:[#allocation2] sm:$0xf]  ;;  %s983_s15 = sshll.u32 %s282_s11, 4  ;;  %s1857_s15 = int_to_ptr.vmem [resolvable:$true] %s983_s15 }
 0x158   : > { %s1419_s25 = scalar_lea.vmem %s1857_s15, 128 }
 0x159   : > { %p1420_p8 = scmp.ne.s32.totalorder %s1857_s15, %s1419_s25 }
 0x15a   : > { %406 = vrot.lane.b32.xlu0 %v358_v13, %s1520_s27  ;;  %386 = vrot.lane.b32.xlu1 %v1772_v11, %s1521_s14 }
 0x15b   : > { %p1421_p1 = pnand %p1420_p8, %p1925_p12 }
 0x15d   : > { %p1422_p10 = pneg %p1421_p1 }
 0x15e   : > { %369 = vrot.lane.b32.xlu0 %v1772_v11, %s1522_s10  ;;  %s1855_s10 = scalar_lea.hbm %s1910_s5, %s1118_s9 }
 0x1c0   : > { %v397_v14 = vpop.permute.xlu1 %396  ;;  %v366_v15 = vpop.permute.xlu0 %365 }
 0x1c1   : > { %400 = vst.msk [vmem:[#allocation3 + $0x8] sm:$0xf] %vm359_vm2, %v397_v14  ;;  %368 = vst.msk [vmem:[#allocation3] sm:$0xf] %vm359_vm2, %v366_v15 }
 0x1c4   : > { %v382_v16 = vpop.permute.xlu0 %381  ;;  %v377_v17 = vpop.permute.xlu1 %376 }
 0x1c5   : > { %385 = vst.msk [vmem:[#allocation3 + $0x4] sm:$0xf] %vm359_vm2, %v382_v16  ;;  %380 = vst.msk [vmem:[#allocation2 + $0x4] sm:$0xf] %vm359_vm2, %v377_v17 }
 0x1c8   : > { %v412_v18 = vpop.permute.xlu0 %411  ;;  %v392_v19 = vpop.permute.xlu1 %391  ;;  %v430_v20 = vld [vmem:[#allocation3] sm:$0xf]  ;;  %v432_v26 = vld [vmem:[#allocation3 + $0x8] sm:$0xf] }
 0x1c9   : > { %415 = vst.msk [vmem:[#allocation3 + $0xc] sm:$0xf] %vm359_vm2, %v412_v18  ;;  %395 = vst.msk [vmem:[#allocation2 + $0x8] sm:$0xf] %vm359_vm2, %v392_v19  ;;  %v443_v21 = vsel %vm438_vm3, %v430_v20, 0  ;;  %v535_v29 = vsel %vm438_vm3, %v432_v26, 0 }
 0x1ca   : > { %1157 = vmatpush3.bf16.xpose.msra.mxu1 %v443_v21 }
 0x1cb   : > { %1168 = vmatprep.subr.bf16.mxu1 %v1512_v0 }
 0x1cc   : > { %v407_v22 = vpop.permute.xlu0 %406  ;;  %v387_v23 = vpop.permute.xlu1 %386  ;;  %v431_v24 = vld [vmem:[#allocation3 + $0x4] sm:$0xf]  ;;  %v427_v31 = vld [vmem:[#allocation2 + $0x4] sm:$0xf] }
 0x1cd   : > { %410 = vst.msk [vmem:[#allocation2 + $0xc] sm:$0xf] %vm359_vm2, %v407_v22  ;;  %390 = vst.msk [vmem:[#allocation4 + $0x4] sm:$0xf] %vm359_vm2, %v387_v23  ;;  %v489_v25 = vsel %vm438_vm3, %v431_v24, 0 }
 0x1ce   : > { %1163 = vmatpush3.bf16.xpose.msra.mxu0 %v489_v25 }
 0x1cf   : > { %1174 = vmatprep.subr.bf16.mxu0 %v1512_v0 }
 0x1d0   : > { %v370_v27 = vpop.permute.xlu0 %369  ;;  %v433_v30 = vld [vmem:[#allocation3 + $0xc] sm:$0xf]  ;;  %v428_v33 = vld [vmem:[#allocation2 + $0x8] sm:$0xf] }
 0x1d1   : > { %372 = vst.msk [vmem:[#allocation4] sm:$0xf] %vm359_vm2, %v370_v27  ;;  %1159 = vmatmul.mubr.msk.bf16.vlgmr.msra.gmra.mrb[0].mxu1 %vm438_vm3, %v426_v28  ;;  %v581_v32 = vsel %vm438_vm3, %v433_v30, 0 }
 0x1d2   : > { %1169 = vmatpush3.bf16.xpose.msra.mxu1 %v535_v29  ;;  %1170 = vmatprep.mubr.msk.bf16.mxu1 %vm1513_vm0, %v1512_v0 }
 0x1d3   : > { %1180 = vmatprep.subr.bf16.mxu1 %v1512_v0 }
 0x1d4   : > { %v435_v36 = vld [vmem:[#allocation4 + $0x4] sm:$0xf]  ;;  %v429_v37 = vld [vmem:[#allocation2 + $0xc] sm:$0xf] }
 0x1d5   : > { %1165 = vmatmul.mubr.msk.bf16.vlgmr.msra.gmra.mrb[4].mxu0 %vm438_vm3, %v427_v31  ;;  %v727_v38 = vsel %vm679_vm4, %v435_v36, 0 }
 0x1d6   : > { %1175 = vmatpush3.bf16.xpose.msra.mxu0 %v581_v32  ;;  %1176 = vmatprep.mubr.msk.bf16.mxu0 %vm1513_vm0, %v1512_v0 }
 0x1d7   : > { %1186 = vmatprep.subr.bf16.mxu0 %v1512_v0 }
 0x1d8   : > { %v434_v34 = vld [vmem:[#allocation4] sm:$0xf] }
 0x1d9   : > { %1171 = vmatmul.mubr.msk.bf16.vlgmr.msra.gmra.mrb[4].mxu1 %vm438_vm3, %v428_v33  ;;  %v681_v35 = vsel %vm679_vm4, %v434_v34, 0 }
 0x1da   : > { %1181 = vmatpush3.bf16.msra.mxu1 %v681_v35  ;;  %1182 = vmatprep.mubr.msk.bf16.mxu1 %vm1513_vm0, %v1512_v0 }
 0x1db   : > { %1192 = vmatprep.subr.bf16.mxu1 %v1512_v0 }
 0x1dd   : > { %1177 = vmatmul.mubr.msk.bf16.vlgmr.msra.gmra.mrb[8].mxu0 %vm438_vm3, %v429_v37 }
 0x1de   : > { %1187 = vmatpush3.bf16.msra.mxu0 %v727_v38  ;;  %1188 = vmatprep.mubr.msk.bf16.mxu0 %vm1513_vm0, %v1512_v0 }
 0x1df   : > { %1198 = vmatprep.subr.bf16.mxu0 %v1512_v0 }
 0x2a4   : > { %v479_v42 = vpop.f32.mrb[0].mxu1 }
 0x2a5   : > { %v632_v43 = vsel %vm629_vm5, %v479_v42, -inf  ;;  %v1160_v44 = vpop.f32.mrb[1].mxu1 }
 0x2a6   : > { %v482_v45 = vpop.f32.mrb[2].mxu1  ;;  %v636_v46 = vsel %vm438_vm3, %v632_v43, -inf }
 0x2a7   : > { %637 = vmax.xlane.f32.xlu1 %v636_v46  ;;  %v1161_v47 = vpop.f32.mrb[3].mxu1 }
 0x2a8   : > { %v525_v48 = vpop.f32.mrb[4].mxu0 }
 0x2a9   : > { %v633_v49 = vsel %vm629_vm5, %v525_v48, -inf  ;;  %v1166_v50 = vpop.f32.mrb[5].mxu0 }
 0x2aa   : > { %v528_v51 = vpop.f32.mrb[6].mxu0  ;;  %v639_v52 = vsel %vm438_vm3, %v633_v49, -inf }
 0x2ab   : > { %640 = vmax.xlane.f32.xlu0 %v639_v52  ;;  %v1167_v53 = vpop.f32.mrb[7].mxu0  ;;  %v1315_v51 = vld [vmem:[#allocation11] sm:$0xff]   ;;  %v1316_v52 = vld [vmem:[#allocation11 + $0x8] sm:$0xff]  }
 0x2ac   : > { %v571_v54 = vpop.f32.mrb[4].mxu1 }
 0x2ad   : > { %v634_v55 = vsel %vm629_vm5, %v571_v54, -inf  ;;  %v1172_v56 = vpop.f32.mrb[5].mxu1 }
 0x2ae   : > { %v574_v57 = vpop.f32.mrb[6].mxu1  ;;  %v642_v58 = vsel %vm438_vm3, %v634_v55, -inf }
 0x2af   : > { %v1173_v59 = vpop.f32.mrb[7].mxu1  ;;  %643 = vmax.xlane.f32.xlu0 %v642_v58 }
 0x2b0   : > { %v617_v60 = vpop.f32.mrb[8].mxu0 }
 0x2b1   : > { %v635_v61 = vsel %vm629_vm5, %v617_v60, -inf  ;;  %v1178_v62 = vpop.f32.mrb[9].mxu0 }
 0x2b2   : > { %v620_v63 = vpop.f32.mrb[10].mxu0  ;;  %v645_v1 = vsel %vm438_vm3, %v635_v61, -inf }
 0x2b3   : > { %646 = vmax.xlane.f32.xlu1 %v645_v1  ;;  %v1179_v2 = vpop.f32.mrb[11].mxu0 }
 0x2c4   : > { %401 = vrot.lane.b32.xlu1 %v1772_v11, %s1523_s16  ;;  %s1528_s16 = smov [#allocation12]  }
 0x2c5   : > { %416 = vrot.lane.b32.xlu0 %v1772_v11, %s1524_s17  ;;  %s1423_s17 = sshll.u32 %s1528_s16, 4  ;;  %s1424_s17 = int_to_ptr.vmem [resolvable:$false] %s1423_s17 }
 0x2c6   : > { %p1426_p3 = scmp.lt.s32.totalorder %s1857_s15, %s1424_s17 }
 0x334   : > { %v638_v3 = vpop.xlane.xlu1 %637 }
 0x335   : > { %v648_v4 = vsub.f32 %v632_v43, %v638_v3 }
 0x337   : > { %v652_v5 = vmul.f32 1.442695, %v648_v4 }
 0x338   : > { %v641_v6 = vpop.xlane.xlu0 %640 }
 0x339   : > { %1317 = vpow2.f32 %v652_v5  ;;  %v649_v7 = vsub.f32 %v633_v49, %v641_v6 }
 0x33b   : > { %v654_v8 = vmul.f32 1.442695, %v649_v7  ;;  %v1113_v7 = vld [vmem:[%s1909_s4] ss:$0 sm:$0xff] }
 0x33c   : > { %v644_v9 = vpop.xlane.xlu0 %643 }
 0x33d   : > { %1319 = vpow2.f32 %v654_v8  ;;  %v650_v10 = vsub.f32 %v634_v55, %v644_v9 }
 0x33f   : > { %v656_v12 = vmul.f32 1.442695, %v650_v10 }
 0x340   : > { %v417_v13 = vpop.permute.xlu0 %416  ;;  %v647_v14 = vpop.xlane.xlu1 %646 }
 0x341   : > { %1321 = vpow2.f32 %v656_v12  ;;  %420 = vst.msk [vmem:[#allocation4 + $0xc] sm:$0xf] %vm359_vm2, %v417_v13  ;;  %v651_v15 = vsub.f32 %v635_v61, %v647_v14 }
 0x343   : > { %v1318_v16 = vpop.eup %1317  ;;  %v658_v17 = vmul.f32 1.442695, %v651_v15 }
 0x344   : > { %v402_v11 = vpop.permute.xlu1 %401  ;;  %v672_v18 = vpack.c.bf16 %v1318_v16, %v1318_v16  ;;  %v660_v26 = vsel %vm438_vm3, %v1318_v16, 0.0 }
 0x345   : > { %1323 = vpow2.f32 %v658_v17  ;;  %405 = vst.msk [vmem:[#allocation4 + $0x8] sm:$0xf] %vm359_vm2, %v402_v11 }
 0x346   : > { %1183 = vmatmul.mubr.msk.bf16.vlgmr.msra.gmra.mrb[8].mxu1 %vm438_vm3, %v672_v18 }
 0x347   : > { %v1320_v19 = vpop.eup %1319  ;;  %1194 = vmatprep.mubr.msk.bf16.mxu1 %vm1513_vm0, %v1512_v0 }
 0x348   : > { %v663_v20 = vsel %vm438_vm3, %v1320_v19, 0.0  ;;  %v673_v21 = vpack.c.bf16 %v1320_v19, %v1320_v19  ;;  %v437_v22 = vld [vmem:[#allocation4 + $0xc] sm:$0xf] }
 0x349   : > { %664 = vadd.xlane.f32.xlu1 %v663_v20  ;;  %v819_v23 = vsel %vm679_vm4, %v437_v22, 0 }
 0x34a   : > { %1189 = vmatmul.mubr.msk.bf16.vlgmr.msra.gmra.mrb[12].mxu0 %vm438_vm3, %v673_v21 }
 0x34b   : > { %v1322_v24 = vpop.eup %1321  ;;  %1199 = vmatpush3.bf16.msra.mxu0 %v819_v23  ;;  %1200 = vmatprep.mubr.msk.bf16.mxu0 %vm1513_vm0, %v1512_v0 }
 0x34c   : > { %v666_v25 = vsel %vm438_vm3, %v1322_v24, 0.0  ;;  %v436_v27 = vld [vmem:[#allocation4 + $0x8] sm:$0xf]  ;;  %v674_v30 = vpack.c.bf16 %v1322_v24, %v1322_v24 }
 0x34d   : > { %667 = vadd.xlane.f32.xlu0 %v666_v25  ;;  %661 = vadd.xlane.f32.xlu1 %v660_v26  ;;  %v773_v28 = vsel %vm679_vm4, %v436_v27, 0 }
 0x34e   : > { %1193 = vmatpush3.bf16.msra.mxu1 %v773_v28 }
 0x34f   : > { %v1324_v29 = vpop.eup %1323  ;;  %1204 = vmatprep.subr.bf16.mxu1 %v1512_v0 }
 0x350   : > { %v669_v31 = vsel %vm438_vm3, %v1324_v29, 0.0  ;;  %v675_v32 = vpack.c.bf16 %v1324_v29, %v1324_v29 }
 0x351   : > { %670 = vadd.xlane.f32.xlu0 %v669_v31  ;;  %1195 = vmatmul.mubr.msk.bf16.vlgmr.msra.gmra.mrb[12].mxu1 %vm438_vm3, %v674_v30 }
 0x352   : > { %1201 = vmatmul.mubr.msk.bf16.vlgmr.msra.gmra.mrb[16].mxu0 %vm438_vm3, %v675_v32  ;;  %1208 = vmatprep.mubr.msk.bf16.mxu1 %vm1513_vm0, %v1512_v0 }
 0x353   : > { %1205 = vmatpush3.bf16.msra.mxu1 %v1315_v51 }
 0x354   : > { %1206 = vmatprep.subr.bf16.mxu1 %v1512_v0 }
 0x357   : > { %1207 = vmatpush3.bf16.msra.mxu1 %v1316_v52 }
 0x3d6   : > { %v665_v33 = vpop.xlane.xlu1 %664 }
 0x3da   : > { %v662_v34 = vpop.xlane.xlu1 %661  ;;  %v668_v35 = vpop.xlane.xlu0 %667 }
 0x3db   : > { %1325 = vrcp.f32 %v662_v34 }
 0x3dc   : > { %1327 = vrcp.f32 %v665_v33 }
 0x3dd   : > { %1329 = vrcp.f32 %v668_v35 }
 0x3de   : > { %v671_v37 = vpop.xlane.xlu0 %670 }
 0x3df   : > { %1331 = vrcp.f32 %v671_v37 }
 0x3e5   : > { %v1326_v36 = vpop.eup %1325 }
 0x3e6   : > { %v1328_v44 = vpop.eup %1327 }
 0x3e7   : > { %v1330_v53 = vpop.eup %1329 }
 0x3e9   : > { %v1332_v58 = vpop.eup %1331 }
 0x419   : > { %v717_v38 = vpop.f32.mrb[8].mxu1 }
 0x41a   : > { %v865_v39 = vmul.f32 %v1326_v36, %v717_v38  ;;  %v1184_v40 = vpop.f32.mrb[9].mxu1 }
 0x41b   : > { %v720_v41 = vpop.f32.mrb[10].mxu1 }
 0x41c   : > { %v869_v42 = vpack.c.bf16 %v865_v39, %v865_v39  ;;  %v1185_v43 = vpop.f32.mrb[11].mxu1 }
 0x41d   : > { %v763_v45 = vpop.f32.mrb[12].mxu0 }
 0x41e   : > { %871 = vst.msk [vmem:[#allocation5] sm:$0xf] %vm359_vm2, %v869_v42  ;;  %v866_v46 = vmul.f32 %v1328_v44, %v763_v45  ;;  %v1190_v47 = vpop.f32.mrb[13].mxu0 }
 0x41f   : > { %v766_v48 = vpop.f32.mrb[14].mxu0 }
 0x420   : > { %v1123_v49 = vpack.c.bf16 %v866_v46, %v866_v46  ;;  %v1191_v50 = vpop.f32.mrb[15].mxu0 }
 0x422   : > { %876 = vrot.lane.b32.xlu0 %v1123_v49, %s1525_s26  ;;  %s1425_s26 = scalar_lea.vmem %s1424_s17, 256 }
 0x423   : > { %p1427_p5 = scmp.lt.s32.totalorder %s1425_s26, %s1419_s25 }
 0x424   : > { %v809_v54 = vpop.f32.mrb[12].mxu1 }
 0x425   : > { %v867_v55 = vmul.f32 %v1330_v53, %v809_v54  ;;  %v1196_v56 = vpop.f32.mrb[13].mxu1  ;;  %v855_v57 = vpop.f32.mrb[16].mxu0  ;;  %p1428_p9 = por %p1427_p5, %p1426_p3 }
 0x426   : > { %v812_v59 = vpop.f32.mrb[14].mxu1  ;;  %v1202_v60 = vpop.f32.mrb[17].mxu0  ;;  %v868_v62 = vmul.f32 %v1332_v58, %v855_v57 }
 0x427   : > { %v1124_v61 = vpack.c.bf16 %v867_v55, %v867_v55  ;;  %v1197_v63 = vpop.f32.mrb[15].mxu1  ;;  %v858_v1 = vpop.f32.mrb[18].mxu0  ;;  %p1429_p11 = pnand %p1428_p9, %p1422_p10 }
 0x428   : > { %v1203_v2 = vpop.f32.mrb[19].mxu0  ;;  %v1125_v3 = vpack.c.bf16 %v868_v62, %v868_v62 }
 0x429   : > { %885 = vrot.lane.b32.xlu1 %v1124_v61, %s1526_s28 }
 0x42d   : > { %894 = vrot.lane.b32.xlu1 %v1125_v3, %s1527_s30 }
 0x494   : > { %v877_v0 = vpop.permute.xlu0 %876 }
 0x495   : > { %880 = vst.msk [vmem:[#allocation5] sm:$0xf] %vm879_vm6, %v877_v0 }
 0x49b   : > { %v886_v4 = vpop.permute.xlu1 %885 }
 0x49c   : > { %889 = vst.msk [vmem:[#allocation5] sm:$0xf] %vm888_vm7, %v886_v4 }
 0x49f   : > { %v895_v5 = vpop.permute.xlu1 %894 }
 0x4a0   : > { %898 = vst.msk [vmem:[#allocation5] sm:$0xf] %vm897_vm8, %v895_v5 }
 0x4a7   : > { %v899_v6 = vld [vmem:[#allocation5] sm:$0xf] }
 0x4a8   : > { %1209 = vmatmul.mubr.msk.bf16.vlgmr.msra.gmra.mrb[16].mxu1 %vm313_vm1, %v899_v6 }
 0x57b   : > { %v961_v8 = vpop.f32.mrb[16].mxu1 }
 0x57c   : > { %v962_v9 = vadd.f32 %v1113_v7, %v961_v8  ;;  %v1210_v10 = vpop.f32.mrb[17].mxu1 }
 0x57d   : > { %v964_v12 = vpop.f32.mrb[18].mxu1 }
 0x57e   : > { %v1211_v13 = vpop.f32.mrb[19].mxu1  ;;  %967 = vst.msk [vmem:[%s282_s11] sm:$0xff] %vm313_vm1, %v962_v9 }
 0x57f   : > { %1432 = shalt.err (!%p1429_p11)
}
 0x580   : > { %s1433_s13 = scalar_lea.hbm %s1855_s10, 128  ;;  %s1437_s24 = scalar_lea.hbm %s1910_s5, 256 }
 0x581   : > { %p1434_p0 = scmp.ne.s32.totalorder %s1855_s10, %s1433_s13  ;;  %p1438_p6 = scmp.lt.u32.totalorder %s1855_s10, %s1910_s5 }
 0x582   : > { %p1439_p7 = scmp.lt.u32.totalorder %s1437_s24, %s1433_s13  ;;  %p1441_p8 = scmp.lt.u32.totalorder %s1433_s13, %s1855_s10 }
 0x583   : > { %p1435_p4 = pnand %p1434_p0, %p1925_p12 }
 0x584   : > { %p1440_p2 = por %p1439_p7, %p1438_p6 }
 0x585   : > { %p1436_p13 = pneg %p1435_p4 }
 0x586   : > { %p1442_p1 = por %p1441_p8, %p1440_p2 }
 0x588   : > { %p1443_p10 = pnand %p1442_p1, %p1436_p13 }
 0x58a   : > { %1446 = shalt.err (!%p1443_p10)
}
 0x58b   : > { %1222 = dma.vmem_to_hbm [thread:$0]  (%p1925_p12), %s1857_s15, 128, %s1855_s10, %s969_s21  }
 0x58c PF: > { %s995_s11 = sand.u32 1, %s1485_s18   ;;  %p1926_p3 = scmp.ne.s32.totalorder %s1918_s29, 0 }
 0x58d   : > { %p1927_p5 = scmp.ge.s32.totalorder %s1505_s23, 2  ;;  %s996_s27 = scalar_lea.sflag [#allocation8], %s995_s11 }
 0x58f   : > { %p1236_p9 = pnand %p1927_p5, %p1926_p3 }
 0x591   : > { %1480 = dma.done.wait (!%p1236_p9), %s996_s27, 128  }
 0x592   : > { %1482 = vsyncadd (!%p1236_p9), %s996_s27, 4294967168  ;;  %s22_s23 = sadd.s32 1, %s1505_s23   ;;  %s1928_s18 = smov %s1489_s19 }
 0x593   : > { %p19_p11 = scmp.ge.s32.totalorder %s22_s23, 4   ;;  %s1929_s19 = smov %s1493_s20 }
 0x594   : > { %s1930_s20 = smov %s1701_s6  ;;  %s1931_s21 = smov %s1501_s22 }
 0x595   : > { %s1932_s22 = smov %s1934_s12  ;;  %21 = sbr.rel (!%p19_p11) target bundleno = 7 (0x7), region = 107 }
 0x59c   :  { %1001 = vsyncpa [#allocation7], 1 }
 0x59d   :  { %1003 = vsyncpa [#allocation7 + $0x1], 1 }
 0x59e   :  { %1004 = vsyncpa [#allocation10], 1 }
 0x59f   :  { %1005 = vsyncpa [#allocation8], 1 }
 0x5a0   :  { %1007 = vsyncpa [#allocation8 + $0x1], 1 }

</bundles_post_ra>
